<compile_context>
chip_gen: v7x
topology: tpu7x:2x2x1
jax: 0.10.0
libtpu: 0.0.40
codegen_flags: <defaults>
</compile_context>

<pallas_src>
import jax
import jax.numpy as jnp
from jax.experimental import pallas as pl
from jax.experimental.pallas import tpu as pltpu


def _triplet_hinge_kernel(a_ref, p_ref, n_ref, out_ref, pos_sq_ref, neg_sq_ref):
    """Grid = (row_blocks, feature_blocks).  Accumulates per-row sum-of-squares
    over the feature axis; emits per-row hinge at the last feature step."""
    j = pl.program_id(1)

    @pl.when(j == 0)
    def _():
        pos_sq_ref[...] = jnp.zeros_like(pos_sq_ref)
        neg_sq_ref[...] = jnp.zeros_like(neg_sq_ref)

    a = a_ref[...].astype(jnp.float32)
    dp = a - p_ref[...].astype(jnp.float32)
    dn = a - n_ref[...].astype(jnp.float32)

    pos_sq_ref[...] += jnp.sum(dp * dp, axis=1, keepdims=True)  # (block_rows, 1)
    neg_sq_ref[...] += jnp.sum(dn * dn, axis=1, keepdims=True)  # (block_rows, 1)

    @pl.when(j == pl.num_programs(1) - 1)
    def _():
        pos_d = jnp.sqrt(pos_sq_ref[...])
        neg_d = jnp.sqrt(neg_sq_ref[...])
        out_ref[...] = jnp.maximum(pos_d - neg_d + 1.0, 0.0)


def mytryoshka_loss(anchor, positive, negative, *,
                    max_block_rows=1024,
                    max_d_block=2048,
                    vmem_budget_bytes=24 * 1024 * 1024):
    """Pallas TPU implementation of the triplet margin loss (margin = 1)."""
    assert anchor.shape == positive.shape == negative.shape
    assert anchor.ndim == 2
    B, D = anchor.shape
    itemsize = jnp.dtype(anchor.dtype).itemsize
    sublane = max(8, 32 // itemsize)  # 8 for f32, 16 for bf16

    # ---- lane-dense feature tiling (multiple of 128) ----
    d_pad128 = -(-D // 128) * 128
    d_block = d_pad128 if d_pad128 <= max_d_block else max_d_block
    D_pad = -(-d_pad128 // d_block) * d_block

    # ---- row-block size from the VMEM pipeline-buffer budget ----
    # 3 inputs x 2 pipeline buffers per input tile.
    bytes_per_row = 3 * 2 * d_block * itemsize
    max_rows = max(sublane, (vmem_budget_bytes // bytes_per_row) // sublane * sublane)
    block_rows = min(max_block_rows, max_rows)
    block_rows = min(block_rows, -(-B // sublane) * sublane)
    block_rows = max(sublane, (block_rows // sublane) * sublane)

    B_pad = -(-B // block_rows) * block_rows

    # Zero-pad host-side.  Zero-padded feature columns contribute 0 to the
    # squared distances; zero-padded rows are sliced off before the mean.
    def _pad(x):
        return jnp.pad(x, ((0, B_pad - B), (0, D_pad - D)))

    a, p, n = _pad(anchor), _pad(positive), _pad(negative)

    grid = (B_pad // block_rows, D_pad // d_block)
    in_spec = pl.BlockSpec((block_rows, d_block), lambda i, j: (i, j))
    out_spec = pl.BlockSpec((block_rows, 1), lambda i, j: (i, 0))

    hinge = pl.pallas_call(
        _triplet_hinge_kernel,
        out_shape=jax.ShapeDtypeStruct((B_pad, 1), jnp.float32),
        grid_spec=pltpu.PrefetchScalarGridSpec(
            num_scalar_prefetch=0,
            grid=grid,
            in_specs=[in_spec, in_spec, in_spec],
            out_specs=out_spec,
            scratch_shapes=[
                pltpu.VMEM((block_rows, 1), jnp.float32),
                pltpu.VMEM((block_rows, 1), jnp.float32),
            ],
        ),
        compiler_params=pltpu.CompilerParams(
            # Row blocks are independent -> parallel (uses both TCs on v7x);
            # feature axis is a sequential reduction -> arbitrary, last.
            dimension_semantics=("parallel", "arbitrary"),
            vmem_limit_bytes=32 * 1024 * 1024,
        ),
    )(a, p, n)

    # Tiny final reduction in plain JAX (keeps the kernel fully parallel).
    return jnp.sum(hinge[:B, 0]) / jnp.float32(B)


def _reference(anchor, positive, negative):
    pos = jnp.linalg.norm(anchor - positive, axis=1)
    neg = jnp.linalg.norm(anchor - negative, axis=1)
    return jnp.mean(jnp.maximum(pos - neg + 1.0, 0.0))


if __name__ == "__main__":
    key = jax.random.PRNGKey(0)
    k1, k2, k3 = jax.random.split(key, 3)

    B, D = 16, 32  # small shapes: batch of 16 embeddings, hidden dim 32
    anchor = jax.random.normal(k1, (B, D), dtype=jnp.float32)
    positive = jax.random.normal(k2, (B, D), dtype=jnp.float32)
    negative = jax.random.normal(k3, (B, D), dtype=jnp.float32)

    loss = mytryoshka_loss(anchor, positive, negative)
    loss = jax.block_until_ready(loss)

    ref = _reference(anchor, positive, negative)
    assert jnp.allclose(loss, ref, rtol=1e-5, atol=1e-5), (loss, ref)

    print("KERNEL_OK")
</pallas_src>

<mosaic_0001>
module attributes {stable_mosaic.version = 11 : i64} {
  func.func @_triplet_hinge_kernel(%arg0: i32, %arg1: i32, %arg2: memref<16x128xf32, #tpu.memory_space<vmem>>, %arg3: memref<16x128xf32, #tpu.memory_space<vmem>>, %arg4: memref<16x128xf32, #tpu.memory_space<vmem>>, %arg5: memref<16x1xf32, #tpu.memory_space<vmem>>, %arg6: memref<16x1xf32, #tpu.memory_space<vmem>>, %arg7: memref<16x1xf32, #tpu.memory_space<vmem>>) attributes {dimension_semantics = [#tpu.dimension_semantics<parallel>, #tpu.dimension_semantics<arbitrary>], iteration_bounds = array<i64: 1, 1>, scalar_prefetch = 0 : i64, scratch_operands = 2 : i64, tpu.core_type = #tpu.core_type<tc>, window_params = [{transform_indices = @transform_0, window_bounds = array<i64: 16, 128>}, {transform_indices = @transform_1, window_bounds = array<i64: 16, 128>}, {transform_indices = @transform_2, window_bounds = array<i64: 16, 128>}, {transform_indices = @transform_3, window_bounds = array<i64: 16, 1>}]} {
    %c0_i32 = arith.constant 0 : i32
    %0 = arith.cmpi eq, %arg1, %c0_i32 : i32
    %1 = arith.extui %0 : i1 to i32
    %c0_i32_0 = arith.constant 0 : i32
    %2 = arith.cmpi ne, %1, %c0_i32_0 : i32
    scf.if %2 {
      %cst_17 = arith.constant 0.000000e+00 : f32
      %23 = vector.broadcast %cst_17 : f32 to vector<16x1xf32>
      %c0_18 = arith.constant 0 : index
      %c0_19 = arith.constant 0 : index
      %24 = vector.load %arg6[%c0_18, %c0_19] : memref<16x1xf32, #tpu.memory_space<vmem>>, vector<16x1xf32>
      tpu.vector_store %arg6[%c0_18, %c0_19], %23 {strides = array<i32>} : memref<16x1xf32, #tpu.memory_space<vmem>>, vector<16x1xf32>,
      %cst_20 = arith.constant 0.000000e+00 : f32
      %25 = vector.broadcast %cst_20 : f32 to vector<16x1xf32>
      %c0_21 = arith.constant 0 : index
      %c0_22 = arith.constant 0 : index
      %26 = vector.load %arg7[%c0_21, %c0_22] : memref<16x1xf32, #tpu.memory_space<vmem>>, vector<16x1xf32>
      tpu.vector_store %arg7[%c0_21, %c0_22], %25 {strides = array<i32>} : memref<16x1xf32, #tpu.memory_space<vmem>>, vector<16x1xf32>,
    } else {
    }
    %c0 = arith.constant 0 : index
    %c0_1 = arith.constant 0 : index
    %3 = vector.load %arg2[%c0, %c0_1] : memref<16x128xf32, #tpu.memory_space<vmem>>, vector<16x128xf32>
    %c0_2 = arith.constant 0 : index
    %c0_3 = arith.constant 0 : index
    %4 = vector.load %arg3[%c0_2, %c0_3] : memref<16x128xf32, #tpu.memory_space<vmem>>, vector<16x128xf32>
    %5 = arith.subf %3, %4 : vector<16x128xf32>
    %c0_4 = arith.constant 0 : index
    %c0_5 = arith.constant 0 : index
    %6 = vector.load %arg4[%c0_4, %c0_5] : memref<16x128xf32, #tpu.memory_space<vmem>>, vector<16x128xf32>
    %7 = arith.subf %3, %6 : vector<16x128xf32>
    %c0_6 = arith.constant 0 : index
    %c0_7 = arith.constant 0 : index
    %8 = vector.load %arg6[%c0_6, %c0_7] : memref<16x1xf32, #tpu.memory_space<vmem>>, vector<16x1xf32>
    %9 = arith.mulf %5, %5 : vector<16x128xf32>
    %cst = arith.constant dense<0.000000e+00> : vector<16xf32>
    %10 = vector.multi_reduction <add>, %9, %cst [1] : vector<16x128xf32> to vector<16xf32>
    %11 = vector.shape_cast %10 : vector<16xf32> to vector<16x1xf32>
    %12 = arith.addf %8, %11 : vector<16x1xf32>
    %c0_8 = arith.constant 0 : index
    %c0_9 = arith.constant 0 : index
    %13 = vector.load %arg6[%c0_8, %c0_9] : memref<16x1xf32, #tpu.memory_space<vmem>>, vector<16x1xf32>
    tpu.vector_store %arg6[%c0_8, %c0_9], %12 {strides = array<i32>} : memref<16x1xf32, #tpu.memory_space<vmem>>, vector<16x1xf32>,
    %c0_10 = arith.constant 0 : index
    %c0_11 = arith.constant 0 : index
    %14 = vector.load %arg7[%c0_10, %c0_11] : memref<16x1xf32, #tpu.memory_space<vmem>>, vector<16x1xf32>
    %15 = arith.mulf %7, %7 : vector<16x128xf32>
    %cst_12 = arith.constant dense<0.000000e+00> : vector<16xf32>
    %16 = vector.multi_reduction <add>, %15, %cst_12 [1] : vector<16x128xf32> to vector<16xf32>
    %17 = vector.shape_cast %16 : vector<16xf32> to vector<16x1xf32>
    %18 = arith.addf %14, %17 : vector<16x1xf32>
    %c0_13 = arith.constant 0 : index
    %c0_14 = arith.constant 0 : index
    %19 = vector.load %arg7[%c0_13, %c0_14] : memref<16x1xf32, #tpu.memory_space<vmem>>, vector<16x1xf32>
    tpu.vector_store %arg7[%c0_13, %c0_14], %18 {strides = array<i32>} : memref<16x1xf32, #tpu.memory_space<vmem>>, vector<16x1xf32>,
    %c0_i32_15 = arith.constant 0 : i32
    %20 = arith.cmpi eq, %arg1, %c0_i32_15 : i32
    %21 = arith.extui %20 : i1 to i32
    %c0_i32_16 = arith.constant 0 : i32
    %22 = arith.cmpi ne, %21, %c0_i32_16 : i32
    scf.if %22 {
      %c0_17 = arith.constant 0 : index
      %c0_18 = arith.constant 0 : index
      %23 = vector.load %arg6[%c0_17, %c0_18] : memref<16x1xf32, #tpu.memory_space<vmem>>, vector<16x1xf32>
      %24 = math.sqrt %23 : vector<16x1xf32>
      %c0_19 = arith.constant 0 : index
      %c0_20 = arith.constant 0 : index
      %25 = vector.load %arg7[%c0_19, %c0_20] : memref<16x1xf32, #tpu.memory_space<vmem>>, vector<16x1xf32>
      %26 = math.sqrt %25 : vector<16x1xf32>
      %27 = arith.subf %24, %26 : vector<16x1xf32>
      %cst_21 = arith.constant 1.000000e+00 : f32
      %28 = vector.broadcast %cst_21 : f32 to vector<16x1xf32>
      %29 = arith.addf %27, %28 : vector<16x1xf32>
      %cst_22 = arith.constant 0.000000e+00 : f32
      %30 = vector.broadcast %cst_22 : f32 to vector<16x1xf32>
      %31 = arith.maximumf %29, %30 : vector<16x1xf32>
      %c0_23 = arith.constant 0 : index
      %c0_24 = arith.constant 0 : index
      %32 = vector.load %arg5[%c0_23, %c0_24] : memref<16x1xf32, #tpu.memory_space<vmem>>, vector<16x1xf32>
      tpu.vector_store %arg5[%c0_23, %c0_24], %31 {strides = array<i32>} : memref<16x1xf32, #tpu.memory_space<vmem>>, vector<16x1xf32>,
    } else {
    }
    return
  }
  func.func @transform_0(%arg0: i32, %arg1: i32) -> (i32, i32) {
    %c0_i32 = arith.constant 0 : i32
    return %arg0, %arg1 : i32, i32
  }
  func.func @transform_1(%arg0: i32, %arg1: i32) -> (i32, i32) {
    %c0_i32 = arith.constant 0 : i32
    return %arg0, %arg1 : i32, i32
  }
  func.func @transform_2(%arg0: i32, %arg1: i32) -> (i32, i32) {
    %c0_i32 = arith.constant 0 : i32
    return %arg0, %arg1 : i32, i32
  }
  func.func @transform_3(%arg0: i32, %arg1: i32) -> (i32, i32) {
    %c0_i32 = arith.constant 0 : i32
    %c0_i32_0 = arith.constant 0 : i32
    return %arg0, %c0_i32 : i32, i32
  }
}

</mosaic_0001>

<bundles_post_ra>
// kernel: tpu_custom_call.1
= control target key start
LH: loop header
LB: loop body
LE: loop exit
PB: predicated region body
PF: predicated region fallthrough
CT: control target
= control target key end

     0   :  { %8 = vsyncpa [#allocation5], 0  ;;  %s326_s0 = inlined_call_operand.hbm [shape: f32[16,128], index: 0, kind: input, shape index: {}]   ;;  %s327_s1 = inlined_call_operand.hbm [shape: f32[16,128], index: 1, kind: input, shape index: {}]   ;;  %s328_s2 = inlined_call_operand.hbm [shape: f32[16,128], index: 2, kind: input, shape index: {}]   ;;  %s329_s3 = inlined_call_operand.vmem [shape: f32[16,1], index: 3, kind: output, shape index: {}]  }
   0x1   :  { %9 = vsyncpa [#allocation7], 0  ;;  %s232_s12 = smov [#allocation6]   ;;  %s233_s14 = smov [#allocation4]  }
   0x2   :  { %s27_s13 = sshll.u32 %s232_s12, 4  ;;  %s15_s15 = sshll.u32 %s233_s14, 4  ;;  %s28_s13 = int_to_ptr.vmem [resolvable:$true] %s27_s13  ;;  %s258_s15 = int_to_ptr.vmem [resolvable:$true] %s15_s15 }
   0x3   :  { %s162_s18 = scalar_lea.hbm %s327_s1, 256 }
   0x4   :  { %p163_p0 = scmp.ne.s32.totalorder %s327_s1, %s162_s18  ;;  %p166_p1 = scmp.lt.u32.totalorder %s162_s18, %s327_s1 }
   0x6   :  { %p168_p2 = pnand %p166_p1, %p163_p0 }
   0x8   :  { %171 = shalt.err (!%p168_p2)
}
   0x9   :  { %s172_s23 = scalar_lea.vmem %s28_s13, 256  ;;  %p177_p4 = scmp.lt.s32.totalorder %s28_s13, %s28_s13 }
   0xa   :  { %p173_p3 = scmp.ne.s32.totalorder %s28_s13, %s172_s23  ;;  %p178_p5 = scmp.lt.s32.totalorder %s172_s23, %s172_s23 }
   0xc   :  { %p179_p6 = por %p178_p5, %p177_p4 }
   0xe   :  { %p180_p7 = pnand %p179_p6, %p173_p3 }
  0x10   :  { %183 = shalt.err (!%p180_p7)
}
  0x11   :  { %s234_s24 = smov 128   ;;  %s235_s25 = smov 8  }
  0x12   :  { %33 = dma.hbm_to_vmem [thread:$0]  %s327_s1, 256, %s28_s13, [#allocation7], %s234_s24, %s234_s24, %s235_s25  }
  0x13   :  { %s184_s30 = scalar_lea.hbm %s326_s0, 256 }
  0x14   :  { %p185_p8 = scmp.ne.s32.totalorder %s326_s0, %s184_s30  ;;  %p188_p9 = scmp.lt.u32.totalorder %s184_s30, %s326_s0 }
  0x16   :  { %p190_p10 = pnand %p188_p9, %p185_p8 }
  0x18   :  { %193 = shalt.err (!%p190_p10)
}
  0x19   :  { %s194_s8 = scalar_lea.vmem %s258_s15, 256  ;;  %p199_p12 = scmp.lt.s32.totalorder %s258_s15, %s258_s15 }
  0x1a   :  { %p195_p11 = scmp.ne.s32.totalorder %s258_s15, %s194_s8  ;;  %p200_p13 = scmp.lt.s32.totalorder %s194_s8, %s194_s8 }
  0x1c   :  { %p201_p0 = por %p200_p13, %p199_p12 }
  0x1e   :  { %p202_p1 = pnand %p201_p0, %p195_p11 }
  0x20   :  { %205 = shalt.err (!%p202_p1)
}
  0x21   :  { %21 = dma.hbm_to_vmem [thread:$0]  %s326_s0, 256, %s258_s15, [#allocation5], %s234_s24, %s234_s24, %s235_s25  }
  0x22   :  { %s236_s10 = smov [#allocation8]   ;;  %s206_s14 = scalar_lea.hbm %s328_s2, 256 }
  0x23   :  { %s39_s11 = sshll.u32 %s236_s10, 4  ;;  %p207_p2 = scmp.ne.s32.totalorder %s328_s2, %s206_s14  ;;  %s40_s11 = int_to_ptr.vmem [resolvable:$true] %s39_s11 }
  0x24   :  { %p210_p3 = scmp.lt.u32.totalorder %s206_s14, %s328_s2 }
  0x26   :  { %p212_p4 = pnand %p210_p3, %p207_p2 }
  0x28   :  { %215 = shalt.err (!%p212_p4)
}
  0x29   :  { %s216_s20 = scalar_lea.vmem %s40_s11, 256  ;;  %p221_p6 = scmp.lt.s32.totalorder %s40_s11, %s40_s11 }
  0x2a   :  { %p217_p5 = scmp.ne.s32.totalorder %s40_s11, %s216_s20  ;;  %p222_p7 = scmp.lt.s32.totalorder %s216_s20, %s216_s20 }
  0x2c   :  { %p223_p8 = por %p222_p7, %p221_p6 }
  0x2e   :  { %p224_p9 = pnand %p223_p8, %p217_p5 }
  0x30   :  { %227 = shalt.err (!%p224_p9)
}
  0x31   :  { %45 = dma.hbm_to_vmem [thread:$0]  %s328_s2, 256, %s40_s11, [#allocation7], %s234_s24, %s234_s24, %s235_s25  }
  0x32   :  { %228 = dma.done.wait [#allocation5], 256  }
  0x33   :  { %229 = vsyncadd [#allocation5], 4294967040 }
  0x34   :  { %230 = dma.done.wait [#allocation7], 512  }
  0x35   :  { %231 = vsyncadd [#allocation7], 4294966784  ;;  %vm59_vm0 = vcmask 7168   ;;  %v237_v0 = vmov 0.0   ;;  %v64_v1 = vld [vmem:[#allocation4] sm:$0xff]  ;;  %v66_v3 = vld [vmem:[#allocation6] sm:$0xff] }
  0x36   :  { %62 = vst.msk [vmem:[#allocation3] sm:$0xff] %vm59_vm0, %v237_v0  ;;  %60 = vst.msk [vmem:[#allocation2] sm:$0xff] %vm59_vm0, %v237_v0  ;;  %v70_v2 = vld [vmem:[#allocation8] sm:$0xff]  ;;  %v68_v5 = vsub.f32 %v64_v1, %v66_v3  ;;  %v65_v6 = vld [vmem:[#allocation4 + $0x8] sm:$0xff] }
  0x37   :  { %61 = vst.msk [vmem:[#allocation2 + $0x8] sm:$0xff] %vm59_vm0, %v237_v0  ;;  %63 = vst.msk [vmem:[#allocation3 + $0x8] sm:$0xff] %vm59_vm0, %v237_v0  ;;  %v72_v4 = vsub.f32 %v64_v1, %v70_v2  ;;  %v71_v7 = vld [vmem:[#allocation8 + $0x8] sm:$0xff]  ;;  %v67_v8 = vld [vmem:[#allocation6 + $0x8] sm:$0xff] }
  0x38   :  { %v73_v9 = vsub.f32 %v65_v6, %v71_v7  ;;  %v69_v10 = vsub.f32 %v65_v6, %v67_v8  ;;  %v76_v12 = vmul.f32 %v68_v5, %v68_v5 }
  0x39   :  { %v89_v11 = vmul.f32 %v72_v4, %v72_v4 }
  0x3a   :  { %78 = vadd.xlane.f32.xlu0 %v76_v12  ;;  %v90_v13 = vmul.f32 %v73_v9, %v73_v9  ;;  %v77_v14 = vmul.f32 %v69_v10, %v69_v10 }
  0x3b   :  { %91 = vadd.xlane.f32.xlu1 %v89_v11 }
  0x3d   :  { %v87_v15 = vld [vmem:[#allocation3] sm:$0xff]  ;;  %v74_v16 = vld [vmem:[#allocation2] sm:$0xff] }
  0x3e   :  { %80 = vadd.xlane.f32.xlu0 %v77_v14  ;;  %v88_v21 = vld [vmem:[#allocation3 + $0x8] sm:$0xff]  ;;  %v75_v22 = vld [vmem:[#allocation2 + $0x8] sm:$0xff] }
  0x3f   :  { %93 = vadd.xlane.f32.xlu1 %v90_v13 }
  0xc7   :  { %v79_v18 = vpop.xlane.xlu0 %78 }
  0xc8   :  { %v92_v17 = vpop.xlane.xlu1 %91  ;;  %v82_v20 = vadd.f32 %v79_v18, %v74_v16 }
  0xc9   :  { %v95_v19 = vadd.f32 %v92_v17, %v87_v15 }
  0xca   :  { %85 = vst.msk [vmem:[#allocation2] sm:$0xff] %vm59_vm0, %v82_v20 }
  0xcb   :  { %97 = vst.msk [vmem:[#allocation3] sm:$0xff] %vm59_vm0, %v95_v19  ;;  %v81_v24 = vpop.xlane.xlu0 %80 }
  0xcc   :  { %v94_v23 = vpop.xlane.xlu1 %93  ;;  %v83_v26 = vadd.f32 %v81_v24, %v75_v22 }
  0xcd   :  { %v96_v25 = vadd.f32 %v94_v23, %v88_v21 }
  0xce   :  { %86 = vst.msk [vmem:[#allocation2 + $0x8] sm:$0xff] %vm59_vm0, %v83_v26 }
  0xcf   :  { %98 = vst.msk [vmem:[#allocation3 + $0x8] sm:$0xff] %vm59_vm0, %v96_v25 }
  0xd1   :  { %v102_v28 = vld [vmem:[#allocation2] sm:$0xff] }
  0xd2   :  { %v118_v27 = vld [vmem:[#allocation3] sm:$0xff]  ;;  %vm106_vm3 = vcmp.eq.f32.partialorder %v102_v28, inf  ;;  %v109_v37 = vand.u32 2147483648, %v102_v28  ;;  %vm108_vm4 = vcmp.eq.f32.partialorder %v102_v28, 0.0 }
  0xd3   :  { %154 = vrsqrt.f32 %v118_v27  ;;  %vm122_vm1 = vcmp.eq.f32.partialorder %v118_v27, inf  ;;  %v125_v34 = vand.u32 2147483648, %v118_v27  ;;  %vm124_vm2 = vcmp.eq.f32.partialorder %v118_v27, 0.0 }
  0xd4   :  { %156 = vrsqrt.f32 %v102_v28 }
  0xd5   :  { %v103_v30 = vld [vmem:[#allocation2 + $0x8] sm:$0xff] }
  0xd6   :  { %v119_v29 = vld [vmem:[#allocation3 + $0x8] sm:$0xff]  ;;  %vm113_vm7 = vcmp.eq.f32.partialorder %v103_v30, inf  ;;  %v116_v48 = vand.u32 2147483648, %v103_v30  ;;  %vm115_vm8 = vcmp.eq.f32.partialorder %v103_v30, 0.0 }
  0xd7   :  { %158 = vrsqrt.f32 %v119_v29  ;;  %vm129_vm5 = vcmp.eq.f32.partialorder %v119_v29, inf  ;;  %v132_v45 = vand.u32 2147483648, %v119_v29  ;;  %vm131_vm6 = vcmp.eq.f32.partialorder %v119_v29, 0.0 }
  0xd8   :  { %160 = vrsqrt.f32 %v103_v30 }
  0xdd   :  { %v155_v31 = vpop.eup %154 }
  0xde   :  { %v157_v32 = vpop.eup %156  ;;  %v121_v33 = vmul.f32 %v155_v31, %v118_v27 }
  0xdf   :  { %v105_v35 = vmul.f32 %v157_v32, %v102_v28 }
  0xe0   :  { %v123_v36 = vsel %vm122_vm1, %v118_v27, %v121_v33 }
  0xe1   :  { %v159_v38 = vpop.eup %158  ;;  %v126_v39 = vsel %vm124_vm2, %v125_v34, %v123_v36  ;;  %v107_v40 = vsel %vm106_vm3, %v102_v28, %v105_v35 }
  0xe2   :  { %v161_v41 = vpop.eup %160  ;;  %v110_v42 = vsel %vm108_vm4, %v109_v37, %v107_v40  ;;  %v128_v43 = vmul.f32 %v159_v38, %v119_v29 }
  0xe3   :  { %v134_v44 = vsub.f32 %v110_v42, %v126_v39  ;;  %v112_v46 = vmul.f32 %v161_v41, %v103_v30 }
  0xe4   :  { %v130_v47 = vsel %vm129_vm5, %v119_v29, %v128_v43 }
  0xe5   :  { %v136_v49 = vadd.f32 1.0, %v134_v44  ;;  %v133_v50 = vsel %vm131_vm6, %v132_v45, %v130_v47  ;;  %v114_v51 = vsel %vm113_vm7, %v103_v30, %v112_v46 }
  0xe6   :  { %v117_v52 = vsel %vm115_vm8, %v116_v48, %v114_v51 }
  0xe7   :  { %v138_v53 = vmax.f32 %v136_v49, 0.0  ;;  %v135_v54 = vsub.f32 %v117_v52, %v133_v50 }
  0xe9   :  { %140 = vst.msk [vmem:[%s329_s3] sm:$0xff] %vm59_vm0, %v138_v53  ;;  %v137_v55 = vadd.f32 1.0, %v135_v54 }
  0xeb   :  { %v139_v56 = vmax.f32 %v137_v55, 0.0 }
  0xed   :  { %141 = vst.msk [vmem:[%s329_s3 + $0x8] sm:$0xff] %vm59_vm0, %v139_v56 }
  0xee   :  { %146 = vsyncpa [#allocation5], 1 }
  0xef   :  { %147 = vsyncpa [#allocation7], 1 }

</bundles_post_ra>
